<compile_context>
chip_gen: v7x
topology: tpu7x:2x2x1
jax: 0.10.0
libtpu: 0.0.40
codegen_flags: <defaults>
</compile_context>

<pallas_src>
import numpy as np

import jax
import jax.numpy as jnp
from jax.experimental import pallas as pl
from jax.experimental.pallas import tpu as pltpu

MXU_DTYPE = jnp.bfloat16       # matmul-operand dtype (accumulation is always f32)
STATE_DTYPE = jnp.float32      # HBM dtype of the packed recurrent state (bf16 = v5e option)
_AUX_DF, _AUX_GM, _AUX_DELTA, _AUX_W = 0, 10, 20, 30   # column layout of the aux stream
_MAX_ROW_BLOCK = 1024


def _round_up(x, m):
    return ((x + m - 1) // m) * m


def _pick_row_tile(n):
    # Small graphs: one tile (launch-bound; full-extent block satisfies the (8,128) rule).
    if n <= 256:
        return n
    # Large graphs: >=2 tiles so dimension_semantics=("parallel",) can spread across
    # v7x's two TensorCores; capped so the tile budget also fits v7x's 64 MiB VMEM.
    return min(_MAX_ROW_BLOCK, _round_up(-(-n // 2), 8))


# ------------------------------ fused kernel --------------------------------

def _make_kernel(hidden_dim, num_layers, has_state_input, fresh):
    H, L = hidden_dim, num_layers

    def kernel(*refs):
        it = iter(refs)
        x_ref = next(it)                                # [tm, D]   f32 raw graph features
        aux_ref = next(it)                              # [tm, 30]  f32 [df | gm | gm - x[:,14:24]]
        enc_w = next(it)                                # [D, H]    MXU dtype
        enc_b = next(it)                                # [1, H]    f32
        enc_aux_w = next(it)                            # [30, H]   rows 20:30 = enc_w[14:24]
        w_ih = [next(it) for _ in range(L)]             # [H, 4H]   gate cols [i, f, o, g]
        w_hh = [next(it) for _ in range(L)]             # [H, 4H]
        w_aux = [next(it) for _ in range(L)]            # [30, 4H]  W_ih rows of the injected cols
        b_g = [next(it) for _ in range(L)]              # [1, 4H]   f32 (b_ih + b_hh)
        dec1_wh = next(it)                              # [H, 64]
        dec1_wc = next(it)                              # [H, 64]
        dec1_b = next(it)                               # [1, 64]   f32
        dec2_w = next(it)                               # [64, OUT]
        dec2_b = next(it)                               # [1, OUT]  f32
        st_in = next(it) if has_state_input else None   # [tm, 2LH] packed [H_0..H_{L-1}, C_0..C_{L-1}]
        st_out = next(it)                               # [tm, 2LH]
        y_ref = next(it)                                # [tm, OUT]

        def mm(a, w_ref):
            w = w_ref[...]
            return jnp.dot(a.astype(w.dtype), w, preferred_element_type=jnp.float32)

        x = x_ref[...]
        aux = aux_ref[...]
        col = jax.lax.broadcasted_iota(jnp.int32, (1, H), 1)

        # graph_encoder(graph_node), pre-ReLU: shared by X (via a rank-10 gm delta) and by
        # every fresh-state initializer -> only one full encoder matmul per tile.
        raw_pre = mm(x, enc_w) + enc_b[...]
        # create_ground_motion_graph: encoder of graph_node with gm injected at cols 14:24
        # == raw_pre + (gm - x[:,14:24]) @ enc_w[14:24,:]   (encoder is linear).
        X = jnp.maximum(raw_pre + mm(aux, enc_aux_w), 0.0)

        enc_init = jnp.maximum(raw_pre, 0.0) if any(fresh) else None

        def read_state(slot):
            if fresh[slot]:
                return enc_init
            return st_in[:, slot * H:(slot + 1) * H].astype(jnp.float32)

        h = [read_state(i) for i in range(L)]
        c = [read_state(L + i) for i in range(L)]

        for i in range(L):
            if i == 0:
                # X with its last 10 cols overwritten by decay_factor (post-ReLU): zero
                # those cols before the matmul; aux @ w_aux[0] re-adds df @ W_ih[H-10:, :].
                inp = jnp.where(col < H - 10, X, 0.0)
            else:
                # next_cell_input: previous layer's fresh H with its last 20 cols
                # overwritten by [decay_factor | gm]; same masked-split trick.
                inp = jnp.where(col < H - 20, h[i - 1], 0.0)
            gates = mm(inp, w_ih[i]) + mm(h[i], w_hh[i]) + mm(aux, w_aux[i]) + b_g[i][...]
            sig = jax.nn.sigmoid(gates[:, :3 * H])      # gate cols packed [i, f, o, g]
            i_g = sig[:, 0:H]
            f_g = sig[:, H:2 * H]
            o_g = sig[:, 2 * H:3 * H]
            g_g = jnp.tanh(gates[:, 3 * H:])
            c_new = f_g * c[i] + i_g * g_g              # all f32 (VPU/EUP)
            h_new = o_g * jnp.tanh(c_new)
            h[i], c[i] = h_new, c_new
            # lane-dense packed state block: the HBM writeback is one unmasked 128-wide store
            st_out[:, i * H:(i + 1) * H] = h_new.astype(st_out.dtype)
            st_out[:, (L + i) * H:(L + i + 1) * H] = c_new.astype(st_out.dtype)

        # create_response: Linear(2H,64)+ReLU + Linear(64,out)+ReLU; the [h ; c] concat is
        # replaced by two dots; the [tm,64] hidden never leaves VMEM.
        hid = jnp.maximum(mm(h[L - 1], dec1_wh) + mm(c[L - 1], dec1_wc) + dec1_b[...], 0.0)
        y_ref[...] = jnp.maximum(mm(hid, dec2_w) + dec2_b[...], 0.0).astype(y_ref.dtype)

    return kernel


# ------------------------------ parameter init ------------------------------

def init_params(key, input_dim, hidden_dim, output_dim, num_layers, mxu_dtype=MXU_DTYPE):
    assert input_dim >= 24 and hidden_dim >= 20
    H = hidden_dim
    keys = iter(jax.random.split(key, 7 + 4 * num_layers))

    def uniform(k, shape, fan_in):
        bound = 1.0 / float(fan_in) ** 0.5
        return jax.random.uniform(k, shape, jnp.float32, -bound, bound)

    params = {}
    # graph_encoder: Linear(input_dim -> H) + ReLU
    enc_w = uniform(next(keys), (input_dim, H), input_dim)
    params["enc_w"] = enc_w.astype(mxu_dtype)
    params["enc_b"] = uniform(next(keys), (1, H), input_dim)
    # rank-10 gm-injection delta weight: rows 20:30 of the aux weight are enc_w[14:24, :]
    enc_aux = jnp.zeros((_AUX_W, H), jnp.float32).at[_AUX_DELTA:_AUX_DELTA + 10].set(enc_w[14:24])
    params["enc_aux_w"] = enc_aux.astype(mxu_dtype)

    # LSTM cells. Weights stored transposed ([in, 4H]); gate columns packed [i, f, o, g]
    # (would need a column permutation if loading real PyTorch [i, f, g, o] weights).
    # The W_ih rows that multiply the injected (overwritten) input columns are copied into
    # a [30, 4H] aux weight so the injection becomes a plain extra matmul.
    params["lstm"] = []
    for i in range(num_layers):
        w_ih = uniform(next(keys), (H, 4 * H), H)
        w_hh = uniform(next(keys), (H, 4 * H), H)
        b = uniform(next(keys), (1, 4 * H), H) + uniform(next(keys), (1, 4 * H), H)
        w_aux = jnp.zeros((_AUX_W, 4 * H), jnp.float32)
        if i == 0:
            w_aux = w_aux.at[_AUX_DF:_AUX_DF + 10].set(w_ih[H - 10:H])           # df -> cols [-10:]
        else:
            w_aux = w_aux.at[_AUX_DF:_AUX_DF + 10].set(w_ih[H - 20:H - 10])      # df -> cols [-20:-10]
            w_aux = w_aux.at[_AUX_GM:_AUX_GM + 10].set(w_ih[H - 10:H])           # gm -> cols [-10:]
        params["lstm"].append(dict(w_ih=w_ih.astype(mxu_dtype), w_hh=w_hh.astype(mxu_dtype),
                                   w_aux=w_aux.astype(mxu_dtype), b=b))

    # response_decoder: Linear(2H -> 64) + ReLU + Linear(64 -> out) + ReLU, with the first
    # Linear split into H- and C- halves (avoids the [h ; c] lane concat in-kernel).
    params["dec1_wh"] = uniform(next(keys), (H, 64), 2 * H).astype(mxu_dtype)
    params["dec1_wc"] = uniform(next(keys), (H, 64), 2 * H).astype(mxu_dtype)
    params["dec1_b"] = uniform(next(keys), (1, 64), 2 * H)
    params["dec2_w"] = uniform(next(keys), (64, output_dim), 64).astype(mxu_dtype)
    params["dec2_b"] = uniform(next(keys), (1, output_dim), 64)
    return params


# ------------------------------- forward pass --------------------------------

def _aux_rows(gm, decay_factor, graph_node, ptr):
    """Per-node auxiliary stream [df | gm | gm - graph_node[:,14:24]] -> [N, 30] (fused under jit)."""
    ptr = tuple(int(p) for p in ptr)
    bs = len(ptr) - 1
    counts = [ptr[b + 1] - ptr[b] for b in range(bs)]
    row_to_graph = np.repeat(np.arange(bs), counts)               # static: ptr is static
    gm_rows = jnp.take(gm.reshape(bs, 10).astype(jnp.float32), row_to_graph, axis=0)
    df_rows = jnp.take(decay_factor.reshape(bs, 10).astype(jnp.float32), row_to_graph, axis=0)
    delta = gm_rows - graph_node[:, 14:24].astype(jnp.float32)
    return jnp.concatenate([df_rows, gm_rows, delta], axis=1)


def lstm_decay_step(params, gm, decay_factor, graph_node, state, *, ptr, hidden_dim,
                    num_layers, output_dim, fresh=None):
    """One LSTM_decay forward step, fused into a single pallas_call.

    state : None (every layer initialized from graph_encoder(graph_node)) or the packed
            recurrent state [N, 2*L*H] = concat([H_0..H_{L-1}, C_0..C_{L-1}], axis=1),
            carried packed between steps so state HBM traffic stays lane-dense.
    fresh : optional static tuple of 2L bools selecting which packed slots are
            re-initialized from the encoder (mixed per-layer-None support).
    Returns (state_out, y).
    """
    H, L = hidden_dim, num_layers
    N, D = graph_node.shape
    assert D >= 24 and H >= 20 and gm.shape[0] == (len(ptr) - 1) * 10
    if fresh is None:
        fresh = (state is None,) * (2 * L)
    fresh = tuple(bool(f) for f in fresh)
    has_state = state is not None
    assert has_state or all(fresh)

    x = graph_node.astype(jnp.float32)
    aux = _aux_rows(gm, decay_factor, graph_node, ptr)

    tm = _pick_row_tile(N)
    grid = (pl.cdiv(N, tm),)

    def row_spec(feat):
        return pl.BlockSpec((tm, feat), lambda i: (i, 0))

    def full_spec(a):
        return pl.BlockSpec(a.shape, lambda i: (0,) * a.ndim)

    inputs, in_specs = [], []

    def add(a, spec):
        inputs.append(a)
        in_specs.append(spec)

    add(x, row_spec(D))
    add(aux, row_spec(_AUX_W))
    for a in (params["enc_w"], params["enc_b"], params["enc_aux_w"]):
        add(a, full_spec(a))
    for name in ("w_ih", "w_hh", "w_aux", "b"):
        for layer in params["lstm"]:
            add(layer[name], full_spec(layer[name]))
    for name in ("dec1_wh", "dec1_wc", "dec1_b", "dec2_w", "dec2_b"):
        add(params[name], full_spec(params[name]))

    io_aliases = {}
    state_dtype = STATE_DTYPE
    if has_state:
        state_dtype = state.dtype
        io_aliases[len(inputs)] = 0            # packed state updated in place
        add(state, row_spec(2 * L * H))

    out_shape = (jax.ShapeDtypeStruct((N, 2 * L * H), state_dtype),
                 jax.ShapeDtypeStruct((N, output_dim), jnp.float32))
    out_specs = (row_spec(2 * L * H), row_spec(output_dim))

    state_out, y = pl.pallas_call(
        _make_kernel(H, L, has_state, fresh),
        out_shape=out_shape,
        grid=grid,
        in_specs=in_specs,
        out_specs=out_specs,
        input_output_aliases=io_aliases,
        compiler_params=pltpu.CompilerParams(dimension_semantics=("parallel",)),
    )(*inputs)
    return state_out, y


def pack_state(H_list, C_list, num_nodes, hidden_dim):
    entries = list(H_list) + list(C_list)
    fresh = tuple(e is None for e in entries)
    if all(fresh):
        return None, fresh
    zeros = jnp.zeros((num_nodes, hidden_dim), jnp.float32)
    state = jnp.concatenate([zeros if e is None else e.astype(jnp.float32) for e in entries], axis=1)
    return state, fresh


def unpack_state(state, hidden_dim, num_layers):
    H, L = hidden_dim, num_layers
    H_list = [state[:, i * H:(i + 1) * H] for i in range(L)]
    C_list = [state[:, (L + i) * H:(L + i + 1) * H] for i in range(L)]
    return H_list, C_list


def lstm_decay_forward(params, gm, decay_factor, graph_node, H_list, C_list, *, ptr,
                       hidden_dim, num_layers, output_dim):
    """Original-module API: (H_list, C_list, y) in / out. Per-step loops should prefer
    lstm_decay_step directly (keeps the state packed / lane-dense between steps)."""
    state, fresh = pack_state(H_list, C_list, graph_node.shape[0], hidden_dim)
    state, y = lstm_decay_step(params, gm, decay_factor, graph_node, state, ptr=ptr,
                               hidden_dim=hidden_dim, num_layers=num_layers,
                               output_dim=output_dim, fresh=fresh)
    H_out, C_out = unpack_state(state, hidden_dim, num_layers)
    return H_out, C_out, y


# ----------------------------------- main ------------------------------------

if __name__ == "__main__":
    input_dim = 28      # >= 24 so cols 14:24 exist
    hidden_dim = 32     # >= 20 so cols [-20:-10] / [-10:] exist
    output_dim = 8
    num_layers = 2

    batch_size = 2
    nodes_per_graph = 5
    N = batch_size * nodes_per_graph
    ptr = (0, 5, 10)    # static node offsets per graph

    key = jax.random.PRNGKey(0)
    k_par, k_gm, k_df, k_graph, k_gm2, k_df2 = jax.random.split(key, 6)

    params = init_params(k_par, input_dim, hidden_dim, output_dim, num_layers)

    gm = jax.random.normal(k_gm, (10 * batch_size,), jnp.float32)
    decay_factor = jax.random.normal(k_df, (10 * batch_size,), jnp.float32)
    graph_node = jax.random.normal(k_graph, (N, input_dim), jnp.float32)

    step = jax.jit(lstm_decay_step,
                   static_argnames=("ptr", "hidden_dim", "num_layers", "output_dim", "fresh"))

    # time step 1: fresh recurrent state -> every layer initialized from encoder(graph_node)
    state, y = step(params, gm, decay_factor, graph_node, None,
                    ptr=ptr, hidden_dim=hidden_dim, num_layers=num_layers,
                    output_dim=output_dim)

    # time step 2: packed state fed straight back (aliased in place, lane-dense HBM I/O)
    gm2 = jax.random.normal(k_gm2, (10 * batch_size,), jnp.float32)
    df2 = jax.random.normal(k_df2, (10 * batch_size,), jnp.float32)
    state, y = step(params, gm2, df2, graph_node, state,
                    ptr=ptr, hidden_dim=hidden_dim, num_layers=num_layers,
                    output_dim=output_dim)

    jax.block_until_ready((state, y))

    H_list, C_list = unpack_state(state, hidden_dim, num_layers)
    assert y.shape == (N, output_dim)
    assert state.shape == (N, 2 * num_layers * hidden_dim)
    assert all(h.shape == (N, hidden_dim) for h in H_list)
    assert all(c.shape == (N, hidden_dim) for c in C_list)
    assert bool(jnp.isfinite(y).all()) and bool(jnp.isfinite(state).all())

    # original-module list API (compat wrapper around the same fused kernel)
    H2, C2, y2 = lstm_decay_forward(params, gm, decay_factor, graph_node,
                                    [None] * num_layers, [None] * num_layers,
                                    ptr=ptr, hidden_dim=hidden_dim,
                                    num_layers=num_layers, output_dim=output_dim)
    jax.block_until_ready(y2)
    assert y2.shape == (N, output_dim)

    print("KERNEL_OK")
</pallas_src>

<mosaic_0001>
module attributes {stable_mosaic.version = 11 : i64} {
  func.func @kernel(%arg0: i32, %arg1: memref<10x28xf32, #tpu.memory_space<vmem>>, %arg2: memref<10x30xf32, #tpu.memory_space<vmem>>, %arg3: memref<28x32xbf16, #tpu.memory_space<vmem>>, %arg4: memref<1x32xf32, #tpu.memory_space<vmem>>, %arg5: memref<30x32xbf16, #tpu.memory_space<vmem>>, %arg6: memref<32x128xbf16, #tpu.memory_space<vmem>>, %arg7: memref<32x128xbf16, #tpu.memory_space<vmem>>, %arg8: memref<32x128xbf16, #tpu.memory_space<vmem>>, %arg9: memref<32x128xbf16, #tpu.memory_space<vmem>>, %arg10: memref<30x128xbf16, #tpu.memory_space<vmem>>, %arg11: memref<30x128xbf16, #tpu.memory_space<vmem>>, %arg12: memref<1x128xf32, #tpu.memory_space<vmem>>, %arg13: memref<1x128xf32, #tpu.memory_space<vmem>>, %arg14: memref<32x64xbf16, #tpu.memory_space<vmem>>, %arg15: memref<32x64xbf16, #tpu.memory_space<vmem>>, %arg16: memref<1x64xf32, #tpu.memory_space<vmem>>, %arg17: memref<64x8xbf16, #tpu.memory_space<vmem>>, %arg18: memref<1x8xf32, #tpu.memory_space<vmem>>, %arg19: memref<10x128xf32, #tpu.memory_space<vmem>>, %arg20: memref<10x8xf32, #tpu.memory_space<vmem>>) attributes {dimension_semantics = [#tpu.dimension_semantics<parallel>], iteration_bounds = array<i64: 1>, scalar_prefetch = 0 : i64, scratch_operands = 0 : i64, tpu.core_type = #tpu.core_type<tc>, window_params = [{transform_indices = @transform_0, window_bounds = array<i64: 10, 28>}, {transform_indices = @transform_1, window_bounds = array<i64: 10, 30>}, {pipeline_mode = #tpu.pipeline_mode<synchronous>, transform_indices = @transform_2, window_bounds = array<i64: 28, 32>}, {pipeline_mode = #tpu.pipeline_mode<synchronous>, transform_indices = @transform_3, window_bounds = array<i64: 1, 32>}, {pipeline_mode = #tpu.pipeline_mode<synchronous>, transform_indices = @transform_4, window_bounds = array<i64: 30, 32>}, {pipeline_mode = #tpu.pipeline_mode<synchronous>, transform_indices = @transform_5, window_bounds = array<i64: 32, 128>}, {pipeline_mode = #tpu.pipeline_mode<synchronous>, transform_indices = @transform_6, window_bounds = array<i64: 32, 128>}, {pipeline_mode = #tpu.pipeline_mode<synchronous>, transform_indices = @transform_7, window_bounds = array<i64: 32, 128>}, {pipeline_mode = #tpu.pipeline_mode<synchronous>, transform_indices = @transform_8, window_bounds = array<i64: 32, 128>}, {pipeline_mode = #tpu.pipeline_mode<synchronous>, transform_indices = @transform_9, window_bounds = array<i64: 30, 128>}, {pipeline_mode = #tpu.pipeline_mode<synchronous>, transform_indices = @transform_10, window_bounds = array<i64: 30, 128>}, {pipeline_mode = #tpu.pipeline_mode<synchronous>, transform_indices = @transform_11, window_bounds = array<i64: 1, 128>}, {pipeline_mode = #tpu.pipeline_mode<synchronous>, transform_indices = @transform_12, window_bounds = array<i64: 1, 128>}, {pipeline_mode = #tpu.pipeline_mode<synchronous>, transform_indices = @transform_13, window_bounds = array<i64: 32, 64>}, {pipeline_mode = #tpu.pipeline_mode<synchronous>, transform_indices = @transform_14, window_bounds = array<i64: 32, 64>}, {pipeline_mode = #tpu.pipeline_mode<synchronous>, transform_indices = @transform_15, window_bounds = array<i64: 1, 64>}, {pipeline_mode = #tpu.pipeline_mode<synchronous>, transform_indices = @transform_16, window_bounds = array<i64: 64, 8>}, {pipeline_mode = #tpu.pipeline_mode<synchronous>, transform_indices = @transform_17, window_bounds = array<i64: 1, 8>}, {transform_indices = @transform_18, window_bounds = array<i64: 10, 128>}, {transform_indices = @transform_19, window_bounds = array<i64: 10, 8>}]} {
    %c0 = arith.constant 0 : index
    %c0_0 = arith.constant 0 : index
    %0 = vector.load %arg1[%c0, %c0_0] : memref<10x28xf32, #tpu.memory_space<vmem>>, vector<10x28xf32>
    %c0_1 = arith.constant 0 : index
    %c0_2 = arith.constant 0 : index
    %1 = vector.load %arg2[%c0_1, %c0_2] : memref<10x30xf32, #tpu.memory_space<vmem>>, vector<10x30xf32>
    %2 = tpu.iota {dimensions = array<i32: 1>} : vector<1x32xi32>
    %c0_3 = arith.constant 0 : index
    %c0_4 = arith.constant 0 : index
    %3 = vector.load %arg3[%c0_3, %c0_4] : memref<28x32xbf16, #tpu.memory_space<vmem>>, vector<28x32xbf16>
    %4 = arith.truncf %0 : vector<10x28xf32> to vector<10x28xbf16>
    %cst = arith.constant dense<0.000000e+00> : vector<10x32xf32>
    %5 = tpu.matmul %4, %3, %cst {dimension_numbers = #tpu.dot_dimension_numbers<[1], [0], [0], [1], [0, 0, 1, 1], [], []>} : vector<10x28xbf16>, vector<28x32xbf16>, vector<10x32xf32> -> vector<10x32xf32>
    %c0_5 = arith.constant 0 : index
    %c0_6 = arith.constant 0 : index
    %6 = vector.load %arg4[%c0_5, %c0_6] : memref<1x32xf32, #tpu.memory_space<vmem>>, vector<1x32xf32>
    %7 = vector.broadcast %6 : vector<1x32xf32> to vector<10x32xf32>
    %8 = arith.addf %5, %7 : vector<10x32xf32>
    %c0_7 = arith.constant 0 : index
    %c0_8 = arith.constant 0 : index
    %9 = vector.load %arg5[%c0_7, %c0_8] : memref<30x32xbf16, #tpu.memory_space<vmem>>, vector<30x32xbf16>
    %10 = arith.truncf %1 : vector<10x30xf32> to vector<10x30xbf16>
    %cst_9 = arith.constant dense<0.000000e+00> : vector<10x32xf32>
    %11 = tpu.matmul %10, %9, %cst_9 {dimension_numbers = #tpu.dot_dimension_numbers<[1], [0], [0], [1], [0, 0, 1, 1], [], []>} : vector<10x30xbf16>, vector<30x32xbf16>, vector<10x32xf32> -> vector<10x32xf32>
    %12 = arith.addf %8, %11 : vector<10x32xf32>
    %cst_10 = arith.constant 0.000000e+00 : f32
    %13 = vector.broadcast %cst_10 : f32 to vector<10x32xf32>
    %14 = arith.maximumf %12, %13 : vector<10x32xf32>
    %cst_11 = arith.constant 0.000000e+00 : f32
    %15 = vector.broadcast %cst_11 : f32 to vector<10x32xf32>
    %16 = arith.maximumf %8, %15 : vector<10x32xf32>
    %c22_i32 = arith.constant 22 : i32
    %17 = vector.broadcast %c22_i32 : i32 to vector<1x32xi32>
    %18 = arith.cmpi slt, %2, %17 : vector<1x32xi32>
    %cst_12 = arith.constant 0.000000e+00 : f32
    %19 = vector.shape_cast %18 : vector<1x32xi1> to vector<1x32xi1>
    %20 = vector.broadcast %19 : vector<1x32xi1> to vector<10x32xi1>
    %21 = vector.broadcast %cst_12 : f32 to vector<10x32xf32>
    %22 = arith.select %20, %14, %21 : vector<10x32xi1>, vector<10x32xf32>
    %c0_13 = arith.constant 0 : index
    %c0_14 = arith.constant 0 : index
    %23 = vector.load %arg6[%c0_13, %c0_14] : memref<32x128xbf16, #tpu.memory_space<vmem>>, vector<32x128xbf16>
    %24 = arith.truncf %22 : vector<10x32xf32> to vector<10x32xbf16>
    %cst_15 = arith.constant dense<0.000000e+00> : vector<10x128xf32>
    %25 = tpu.matmul %24, %23, %cst_15 {dimension_numbers = #tpu.dot_dimension_numbers<[1], [0], [0], [1], [0, 0, 1, 1], [], []>} : vector<10x32xbf16>, vector<32x128xbf16>, vector<10x128xf32> -> vector<10x128xf32>
    %c0_16 = arith.constant 0 : index
    %c0_17 = arith.constant 0 : index
    %26 = vector.load %arg8[%c0_16, %c0_17] : memref<32x128xbf16, #tpu.memory_space<vmem>>, vector<32x128xbf16>
    %27 = arith.truncf %16 : vector<10x32xf32> to vector<10x32xbf16>
    %cst_18 = arith.constant dense<0.000000e+00> : vector<10x128xf32>
    %28 = tpu.matmul %27, %26, %cst_18 {dimension_numbers = #tpu.dot_dimension_numbers<[1], [0], [0], [1], [0, 0, 1, 1], [], []>} : vector<10x32xbf16>, vector<32x128xbf16>, vector<10x128xf32> -> vector<10x128xf32>
    %29 = arith.addf %25, %28 : vector<10x128xf32>
    %c0_19 = arith.constant 0 : index
    %c0_20 = arith.constant 0 : index
    %30 = vector.load %arg10[%c0_19, %c0_20] : memref<30x128xbf16, #tpu.memory_space<vmem>>, vector<30x128xbf16>
    %31 = arith.truncf %1 : vector<10x30xf32> to vector<10x30xbf16>
    %cst_21 = arith.constant dense<0.000000e+00> : vector<10x128xf32>
    %32 = tpu.matmul %31, %30, %cst_21 {dimension_numbers = #tpu.dot_dimension_numbers<[1], [0], [0], [1], [0, 0, 1, 1], [], []>} : vector<10x30xbf16>, vector<30x128xbf16>, vector<10x128xf32> -> vector<10x128xf32>
    %33 = arith.addf %29, %32 : vector<10x128xf32>
    %c0_22 = arith.constant 0 : index
    %c0_23 = arith.constant 0 : index
    %34 = vector.load %arg12[%c0_22, %c0_23] : memref<1x128xf32, #tpu.memory_space<vmem>>, vector<1x128xf32>
    %35 = vector.broadcast %34 : vector<1x128xf32> to vector<10x128xf32>
    %36 = arith.addf %33, %35 : vector<10x128xf32>
    %37 = vector.extract_strided_slice %36 {offsets = [0, 0], sizes = [10, 96], strides = [1, 1]} : vector<10x128xf32> to vector<10x96xf32>
    %38 = arith.negf %37 : vector<10x96xf32>
    %39 = math.exp %38 : vector<10x96xf32>
    %cst_24 = arith.constant 1.000000e+00 : f32
    %40 = vector.broadcast %cst_24 : f32 to vector<10x96xf32>
    %41 = arith.addf %40, %39 : vector<10x96xf32>
    %42 = arith.divf %40, %41 : vector<10x96xf32>
    %43 = vector.extract_strided_slice %42 {offsets = [0, 0], sizes = [10, 32], strides = [1, 1]} : vector<10x96xf32> to vector<10x32xf32>
    %44 = vector.extract_strided_slice %42 {offsets = [0, 32], sizes = [10, 32], strides = [1, 1]} : vector<10x96xf32> to vector<10x32xf32>
    %45 = vector.extract_strided_slice %42 {offsets = [0, 64], sizes = [10, 32], strides = [1, 1]} : vector<10x96xf32> to vector<10x32xf32>
    %46 = vector.extract_strided_slice %36 {offsets = [0, 96], sizes = [10, 32], strides = [1, 1]} : vector<10x128xf32> to vector<10x32xf32>
    %47 = math.tanh %46 : vector<10x32xf32>
    %48 = arith.mulf %44, %16 : vector<10x32xf32>
    %49 = arith.mulf %43, %47 : vector<10x32xf32>
    %50 = arith.addf %48, %49 : vector<10x32xf32>
    %51 = math.tanh %50 : vector<10x32xf32>
    %52 = arith.mulf %45, %51 : vector<10x32xf32>
    %c0_25 = arith.constant 0 : index
    %c0_26 = arith.constant 0 : index
    %53 = vector.load %arg19[%c0_25, %c0_26] : memref<10x128xf32, #tpu.memory_space<vmem>>, vector<10x32xf32>
    tpu.vector_store %arg19[%c0_25, %c0_26], %52 {strides = array<i32>} : memref<10x128xf32, #tpu.memory_space<vmem>>, vector<10x32xf32>,
    %c0_27 = arith.constant 0 : index
    %c64 = arith.constant 64 : index
    %54 = vector.load %arg19[%c0_27, %c64] : memref<10x128xf32, #tpu.memory_space<vmem>>, vector<10x32xf32>
    tpu.vector_store %arg19[%c0_27, %c64], %50 {strides = array<i32>} : memref<10x128xf32, #tpu.memory_space<vmem>>, vector<10x32xf32>,
    %c12_i32 = arith.constant 12 : i32
    %55 = vector.broadcast %c12_i32 : i32 to vector<1x32xi32>
    %56 = arith.cmpi slt, %2, %55 : vector<1x32xi32>
    %cst_28 = arith.constant 0.000000e+00 : f32
    %57 = vector.shape_cast %56 : vector<1x32xi1> to vector<1x32xi1>
    %58 = vector.broadcast %57 : vector<1x32xi1> to vector<10x32xi1>
    %59 = vector.broadcast %cst_28 : f32 to vector<10x32xf32>
    %60 = arith.select %58, %52, %59 : vector<10x32xi1>, vector<10x32xf32>
    %c0_29 = arith.constant 0 : index
    %c0_30 = arith.constant 0 : index
    %61 = vector.load %arg7[%c0_29, %c0_30] : memref<32x128xbf16, #tpu.memory_space<vmem>>, vector<32x128xbf16>
    %62 = arith.truncf %60 : vector<10x32xf32> to vector<10x32xbf16>
    %cst_31 = arith.constant dense<0.000000e+00> : vector<10x128xf32>
    %63 = tpu.matmul %62, %61, %cst_31 {dimension_numbers = #tpu.dot_dimension_numbers<[1], [0], [0], [1], [0, 0, 1, 1], [], []>} : vector<10x32xbf16>, vector<32x128xbf16>, vector<10x128xf32> -> vector<10x128xf32>
    %c0_32 = arith.constant 0 : index
    %c0_33 = arith.constant 0 : index
    %64 = vector.load %arg9[%c0_32, %c0_33] : memref<32x128xbf16, #tpu.memory_space<vmem>>, vector<32x128xbf16>
    %65 = arith.truncf %16 : vector<10x32xf32> to vector<10x32xbf16>
    %cst_34 = arith.constant dense<0.000000e+00> : vector<10x128xf32>
    %66 = tpu.matmul %65, %64, %cst_34 {dimension_numbers = #tpu.dot_dimension_numbers<[1], [0], [0], [1], [0, 0, 1, 1], [], []>} : vector<10x32xbf16>, vector<32x128xbf16>, vector<10x128xf32> -> vector<10x128xf32>
    %67 = arith.addf %63, %66 : vector<10x128xf32>
    %c0_35 = arith.constant 0 : index
    %c0_36 = arith.constant 0 : index
    %68 = vector.load %arg11[%c0_35, %c0_36] : memref<30x128xbf16, #tpu.memory_space<vmem>>, vector<30x128xbf16>
    %69 = arith.truncf %1 : vector<10x30xf32> to vector<10x30xbf16>
    %cst_37 = arith.constant dense<0.000000e+00> : vector<10x128xf32>
    %70 = tpu.matmul %69, %68, %cst_37 {dimension_numbers = #tpu.dot_dimension_numbers<[1], [0], [0], [1], [0, 0, 1, 1], [], []>} : vector<10x30xbf16>, vector<30x128xbf16>, vector<10x128xf32> -> vector<10x128xf32>
    %71 = arith.addf %67, %70 : vector<10x128xf32>
    %c0_38 = arith.constant 0 : index
    %c0_39 = arith.constant 0 : index
    %72 = vector.load %arg13[%c0_38, %c0_39] : memref<1x128xf32, #tpu.memory_space<vmem>>, vector<1x128xf32>
    %73 = vector.broadcast %72 : vector<1x128xf32> to vector<10x128xf32>
    %74 = arith.addf %71, %73 : vector<10x128xf32>
    %75 = vector.extract_strided_slice %74 {offsets = [0, 0], sizes = [10, 96], strides = [1, 1]} : vector<10x128xf32> to vector<10x96xf32>
    %76 = arith.negf %75 : vector<10x96xf32>
    %77 = math.exp %76 : vector<10x96xf32>
    %cst_40 = arith.constant 1.000000e+00 : f32
    %78 = vector.broadcast %cst_40 : f32 to vector<10x96xf32>
    %79 = arith.addf %78, %77 : vector<10x96xf32>
    %80 = arith.divf %78, %79 : vector<10x96xf32>
    %81 = vector.extract_strided_slice %80 {offsets = [0, 0], sizes = [10, 32], strides = [1, 1]} : vector<10x96xf32> to vector<10x32xf32>
    %82 = vector.extract_strided_slice %80 {offsets = [0, 32], sizes = [10, 32], strides = [1, 1]} : vector<10x96xf32> to vector<10x32xf32>
    %83 = vector.extract_strided_slice %80 {offsets = [0, 64], sizes = [10, 32], strides = [1, 1]} : vector<10x96xf32> to vector<10x32xf32>
    %84 = vector.extract_strided_slice %74 {offsets = [0, 96], sizes = [10, 32], strides = [1, 1]} : vector<10x128xf32> to vector<10x32xf32>
    %85 = math.tanh %84 : vector<10x32xf32>
    %86 = arith.mulf %82, %16 : vector<10x32xf32>
    %87 = arith.mulf %81, %85 : vector<10x32xf32>
    %88 = arith.addf %86, %87 : vector<10x32xf32>
    %89 = math.tanh %88 : vector<10x32xf32>
    %90 = arith.mulf %83, %89 : vector<10x32xf32>
    %c0_41 = arith.constant 0 : index
    %c32 = arith.constant 32 : index
    %91 = vector.load %arg19[%c0_41, %c32] : memref<10x128xf32, #tpu.memory_space<vmem>>, vector<10x32xf32>
    tpu.vector_store %arg19[%c0_41, %c32], %90 {strides = array<i32>} : memref<10x128xf32, #tpu.memory_space<vmem>>, vector<10x32xf32>,
    %c0_42 = arith.constant 0 : index
    %c96 = arith.constant 96 : index
    %92 = vector.load %arg19[%c0_42, %c96] : memref<10x128xf32, #tpu.memory_space<vmem>>, vector<10x32xf32>
    tpu.vector_store %arg19[%c0_42, %c96], %88 {strides = array<i32>} : memref<10x128xf32, #tpu.memory_space<vmem>>, vector<10x32xf32>,
    %c0_43 = arith.constant 0 : index
    %c0_44 = arith.constant 0 : index
    %93 = vector.load %arg14[%c0_43, %c0_44] : memref<32x64xbf16, #tpu.memory_space<vmem>>, vector<32x64xbf16>
    %94 = arith.truncf %90 : vector<10x32xf32> to vector<10x32xbf16>
    %cst_45 = arith.constant dense<0.000000e+00> : vector<10x64xf32>
    %95 = tpu.matmul %94, %93, %cst_45 {dimension_numbers = #tpu.dot_dimension_numbers<[1], [0], [0], [1], [0, 0, 1, 1], [], []>} : vector<10x32xbf16>, vector<32x64xbf16>, vector<10x64xf32> -> vector<10x64xf32>
    %c0_46 = arith.constant 0 : index
    %c0_47 = arith.constant 0 : index
    %96 = vector.load %arg15[%c0_46, %c0_47] : memref<32x64xbf16, #tpu.memory_space<vmem>>, vector<32x64xbf16>
    %97 = arith.truncf %88 : vector<10x32xf32> to vector<10x32xbf16>
    %cst_48 = arith.constant dense<0.000000e+00> : vector<10x64xf32>
    %98 = tpu.matmul %97, %96, %cst_48 {dimension_numbers = #tpu.dot_dimension_numbers<[1], [0], [0], [1], [0, 0, 1, 1], [], []>} : vector<10x32xbf16>, vector<32x64xbf16>, vector<10x64xf32> -> vector<10x64xf32>
    %99 = arith.addf %95, %98 : vector<10x64xf32>
    %c0_49 = arith.constant 0 : index
    %c0_50 = arith.constant 0 : index
    %100 = vector.load %arg16[%c0_49, %c0_50] : memref<1x64xf32, #tpu.memory_space<vmem>>, vector<1x64xf32>
    %101 = vector.broadcast %100 : vector<1x64xf32> to vector<10x64xf32>
    %102 = arith.addf %99, %101 : vector<10x64xf32>
    %cst_51 = arith.constant 0.000000e+00 : f32
    %103 = vector.broadcast %cst_51 : f32 to vector<10x64xf32>
    %104 = arith.maximumf %102, %103 : vector<10x64xf32>
    %c0_52 = arith.constant 0 : index
    %c0_53 = arith.constant 0 : index
    %105 = vector.load %arg17[%c0_52, %c0_53] : memref<64x8xbf16, #tpu.memory_space<vmem>>, vector<64x8xbf16>
    %106 = arith.truncf %104 : vector<10x64xf32> to vector<10x64xbf16>
    %cst_54 = arith.constant dense<0.000000e+00> : vector<10x8xf32>
    %107 = tpu.matmul %106, %105, %cst_54 {dimension_numbers = #tpu.dot_dimension_numbers<[1], [0], [0], [1], [0, 0, 1, 1], [], []>} : vector<10x64xbf16>, vector<64x8xbf16>, vector<10x8xf32> -> vector<10x8xf32>
    %c0_55 = arith.constant 0 : index
    %c0_56 = arith.constant 0 : index
    %108 = vector.load %arg18[%c0_55, %c0_56] : memref<1x8xf32, #tpu.memory_space<vmem>>, vector<1x8xf32>
    %109 = vector.broadcast %108 : vector<1x8xf32> to vector<10x8xf32>
    %110 = arith.addf %107, %109 : vector<10x8xf32>
    %cst_57 = arith.constant 0.000000e+00 : f32
    %111 = vector.broadcast %cst_57 : f32 to vector<10x8xf32>
    %112 = arith.maximumf %110, %111 : vector<10x8xf32>
    %c0_58 = arith.constant 0 : index
    %c0_59 = arith.constant 0 : index
    %113 = vector.load %arg20[%c0_58, %c0_59] : memref<10x8xf32, #tpu.memory_space<vmem>>, vector<10x8xf32>
    tpu.vector_store %arg20[%c0_58, %c0_59], %112 {strides = array<i32>} : memref<10x8xf32, #tpu.memory_space<vmem>>, vector<10x8xf32>,
    return
  }
  func.func @transform_0(%arg0: i32) -> (i32, i32) {
    %c0_i32 = arith.constant 0 : i32
    %c0_i32_0 = arith.constant 0 : i32
    return %arg0, %c0_i32 : i32, i32
  }
  func.func @transform_1(%arg0: i32) -> (i32, i32) {
    %c0_i32 = arith.constant 0 : i32
    %c0_i32_0 = arith.constant 0 : i32
    return %arg0, %c0_i32 : i32, i32
  }
  func.func @transform_2(%arg0: i32) -> (i32, i32) {
    %c0_i32 = arith.constant 0 : i32
    %c0_i32_0 = arith.constant 0 : i32
    %c0_i32_1 = arith.constant 0 : i32
    return %c0_i32, %c0_i32_0 : i32, i32
  }
  func.func @transform_3(%arg0: i32) -> (i32, i32) {
    %c0_i32 = arith.constant 0 : i32
    %c0_i32_0 = arith.constant 0 : i32
    %c0_i32_1 = arith.constant 0 : i32
    return %c0_i32, %c0_i32_0 : i32, i32
  }
  func.func @transform_4(%arg0: i32) -> (i32, i32) {
    %c0_i32 = arith.constant 0 : i32
    %c0_i32_0 = arith.constant 0 : i32
    %c0_i32_1 = arith.constant 0 : i32
    return %c0_i32, %c0_i32_0 : i32, i32
  }
  func.func @transform_5(%arg0: i32) -> (i32, i32) {
    %c0_i32 = arith.constant 0 : i32
    %c0_i32_0 = arith.constant 0 : i32
    %c0_i32_1 = arith.constant 0 : i32
    return %c0_i32, %c0_i32_0 : i32, i32
  }
  func.func @transform_6(%arg0: i32) -> (i32, i32) {
    %c0_i32 = arith.constant 0 : i32
    %c0_i32_0 = arith.constant 0 : i32
    %c0_i32_1 = arith.constant 0 : i32
    return %c0_i32, %c0_i32_0 : i32, i32
  }
  func.func @transform_7(%arg0: i32) -> (i32, i32) {
    %c0_i32 = arith.constant 0 : i32
    %c0_i32_0 = arith.constant 0 : i32
    %c0_i32_1 = arith.constant 0 : i32
    return %c0_i32, %c0_i32_0 : i32, i32
  }
  func.func @transform_8(%arg0: i32) -> (i32, i32) {
    %c0_i32 = arith.constant 0 : i32
    %c0_i32_0 = arith.constant 0 : i32
    %c0_i32_1 = arith.constant 0 : i32
    return %c0_i32, %c0_i32_0 : i32, i32
  }
  func.func @transform_9(%arg0: i32) -> (i32, i32) {
    %c0_i32 = arith.constant 0 : i32
    %c0_i32_0 = arith.constant 0 : i32
    %c0_i32_1 = arith.constant 0 : i32
    return %c0_i32, %c0_i32_0 : i32, i32
  }
  func.func @transform_10(%arg0: i32) -> (i32, i32) {
    %c0_i32 = arith.constant 0 : i32
    %c0_i32_0 = arith.constant 0 : i32
    %c0_i32_1 = arith.constant 0 : i32
    return %c0_i32, %c0_i32_0 : i32, i32
  }
  func.func @transform_11(%arg0: i32) -> (i32, i32) {
    %c0_i32 = arith.constant 0 : i32
    %c0_i32_0 = arith.constant 0 : i32
    %c0_i32_1 = arith.constant 0 : i32
    return %c0_i32, %c0_i32_0 : i32, i32
  }
  func.func @transform_12(%arg0: i32) -> (i32, i32) {
    %c0_i32 = arith.constant 0 : i32
    %c0_i32_0 = arith.constant 0 : i32
    %c0_i32_1 = arith.constant 0 : i32
    return %c0_i32, %c0_i32_0 : i32, i32
  }
  func.func @transform_13(%arg0: i32) -> (i32, i32) {
    %c0_i32 = arith.constant 0 : i32
    %c0_i32_0 = arith.constant 0 : i32
    %c0_i32_1 = arith.constant 0 : i32
    return %c0_i32, %c0_i32_0 : i32, i32
  }
  func.func @transform_14(%arg0: i32) -> (i32, i32) {
    %c0_i32 = arith.constant 0 : i32
    %c0_i32_0 = arith.constant 0 : i32
    %c0_i32_1 = arith.constant 0 : i32
    return %c0_i32, %c0_i32_0 : i32, i32
  }
  func.func @transform_15(%arg0: i32) -> (i32, i32) {
    %c0_i32 = arith.constant 0 : i32
    %c0_i32_0 = arith.constant 0 : i32
    %c0_i32_1 = arith.constant 0 : i32
    return %c0_i32, %c0_i32_0 : i32, i32
  }
  func.func @transform_16(%arg0: i32) -> (i32, i32) {
    %c0_i32 = arith.constant 0 : i32
    %c0_i32_0 = arith.constant 0 : i32
    %c0_i32_1 = arith.constant 0 : i32
    return %c0_i32, %c0_i32_0 : i32, i32
  }
  func.func @transform_17(%arg0: i32) -> (i32, i32) {
    %c0_i32 = arith.constant 0 : i32
    %c0_i32_0 = arith.constant 0 : i32
    %c0_i32_1 = arith.constant 0 : i32
    return %c0_i32, %c0_i32_0 : i32, i32
  }
  func.func @transform_18(%arg0: i32) -> (i32, i32) {
    %c0_i32 = arith.constant 0 : i32
    %c0_i32_0 = arith.constant 0 : i32
    return %arg0, %c0_i32 : i32, i32
  }
  func.func @transform_19(%arg0: i32) -> (i32, i32) {
    %c0_i32 = arith.constant 0 : i32
    %c0_i32_0 = arith.constant 0 : i32
    return %arg0, %c0_i32 : i32, i32
  }
}

</mosaic_0001>

<bundles_post_ra>
// kernel: lstm_decay_step.1
= control target key start
LH: loop header
LB: loop body
LE: loop exit
PB: predicated region body
PF: predicated region fallthrough
CT: control target
= control target key end

     0   :  { %s1599_s0 = inlined_call_operand.vmem [shape: f32[10,28], index: 0, kind: input, shape index: {}]   ;;  %s1600_s1 = inlined_call_operand.vmem [shape: f32[10,30], index: 1, kind: input, shape index: {}]   ;;  %s1601_s2 = inlined_call_operand.vmem [shape: bf16[28,32], index: 2, kind: input, shape index: {}]   ;;  %s1602_s3 = inlined_call_operand.vmem [shape: f32[1,32], index: 3, kind: input, shape index: {}]   ;;  %s1603_s4 = inlined_call_operand.vmem [shape: bf16[30,32], index: 4, kind: input, shape index: {}]   ;;  %s1604_s5 = inlined_call_operand.vmem [shape: bf16[32,128], index: 5, kind: input, shape index: {}]   ;;  %s1605_s6 = inlined_call_operand.vmem [shape: bf16[32,128], index: 6, kind: input, shape index: {}]   ;;  %s1606_s7 = inlined_call_operand.vmem [shape: bf16[32,128], index: 7, kind: input, shape index: {}]   ;;  %s1607_s8 = inlined_call_operand.vmem [shape: bf16[32,128], index: 8, kind: input, shape index: {}]   ;;  %s1608_s9 = inlined_call_operand.vmem [shape: bf16[30,128], index: 9, kind: input, shape index: {}]   ;;  %s1609_s10 = inlined_call_operand.vmem [shape: bf16[30,128], index: 10, kind: input, shape index: {}]   ;;  %s1610_s11 = inlined_call_operand.vmem [shape: f32[1,128], index: 11, kind: input, shape index: {}]   ;;  %s1611_s12 = inlined_call_operand.vmem [shape: f32[1,128], index: 12, kind: input, shape index: {}]   ;;  %s1612_s13 = inlined_call_operand.vmem [shape: bf16[32,64], index: 13, kind: input, shape index: {}]   ;;  %s1613_s14 = inlined_call_operand.vmem [shape: bf16[32,64], index: 14, kind: input, shape index: {}]   ;;  %s1614_s15 = inlined_call_operand.vmem [shape: f32[1,64], index: 15, kind: input, shape index: {}]   ;;  %s1615_s16 = inlined_call_operand.vmem [shape: bf16[64,8], index: 16, kind: input, shape index: {}]   ;;  %s1616_s17 = inlined_call_operand.vmem [shape: f32[1,8], index: 17, kind: input, shape index: {}]   ;;  %s1617_s18 = inlined_call_operand.hbm [shape: f32[10,128], index: 18, kind: output, shape index: {0}]   ;;  %s1618_s19 = inlined_call_operand.vmem [shape: f32[10,8], index: 19, kind: output, shape index: {1}]  }
   0x1   :  { %1622 = sst [smem:[#allocation5_spill]] %s1599_s0 }
   0x2   :  { %1623 = sst [smem:[#allocation6_spill]] %s1600_s1 }
   0x3   :  { %1624 = sst [smem:[#allocation7_spill]] %s1601_s2 }
   0x4   :  { %1625 = sst [smem:[#allocation8_spill]] %s1602_s3 }
   0x5   :  { %s1626_s20 = sld [smem:[#allocation7_spill]]  ;;  %v1263_v1 = vmov 0.0   ;;  %vm96_vm0 = vcmask 1045504   ;;  %s1627_s23 = sld [smem:[#allocation5_spill]]  ;;  %vm1264_vm1 = vmmov 0   ;;  %vm161_vm2 = vcmask 1046528  }
   0x6   :  { %1083 = vmatprep.subr.bf16.mxu1 %v1263_v1  ;;  %1099 = vmatprep.subr.bf16.mxu0 %v1263_v1  ;;  %v1186_v6 = vld [vmem:[%s1603_s4 + $0x8] sm:$0x7f]   ;;  %vm92_vm3 = vcmask 228352   ;;  %v1185_v8 = vld [vmem:[%s1603_s4] sm:$0xff]   ;;  %vm157_vm4 = vcmask 244736   ;;  %s1628_s30 = sld [smem:[#allocation6_spill]] }
   0x7   :  { %1087 = vmatprep.mubr.msk.bf16.mxu1 %vm1264_vm1, %v1263_v1  ;;  %1103 = vmatprep.mubr.msk.bf16.mxu0 %vm1264_vm1, %v1263_v1  ;;  %v163_v9 = vsel %vm161_vm2, %v1186_v6, 0 }
   0xb   :  { %v1183_v0 = vld [vmem:[%s1626_s20] sm:$0xff]   ;;  %v1184_v2 = vld [vmem:[%s1626_s20 + $0x8] sm:$0x3f]  }
   0xc   :  { %1084 = vmatpush3.bf16.msra.mxu1 %v1183_v0  ;;  %v63_v3 = vld [vmem:[%s1627_s23] sm:$0xff]  ;;  %v64_v4 = vld [vmem:[%s1627_s23 + $0x8] sm:$0x3]  ;;  %v98_v5 = vsel %vm96_vm0, %v1184_v2, 0 }
   0xd   :  { %1085 = vmatprep.subr.bf16.mxu1 %v1263_v1  ;;  %v73_v7 = vpack.c.bf16 %v64_v4, %v63_v3  ;;  %v65_v10 = vld [vmem:[%s1628_s30] sm:$0xff]  ;;  %v66_v11 = vld [vmem:[%s1628_s30 + $0x8] sm:$0x3] }
   0xe   :  { %v1407_v12 = vpack.c.bf16 %v66_v11, %v65_v10 }
  0x10   :  { %1086 = vmatpush3.bf16.msra.mxu1 %v98_v5 }
  0x11   :  { %1091 = vmatprep.subr.bf16.mxu1 %v1263_v1 }
  0x13   :  { %1088 = vmatmul.mubr.msk.bf16.vlgmr.msra.gmra.mrb[0].mxu1 %vm92_vm3, %v73_v7 }
  0x14   :  { %1092 = vmatpush3.bf16.msra.mxu1 %v1185_v8  ;;  %1095 = vmatprep.mubr.msk.bf16.mxu1 %vm1264_vm1, %v1263_v1 }
  0x15   :  { %1093 = vmatprep.subr.bf16.mxu1 %v1263_v1 }
  0x18   :  { %1094 = vmatpush3.bf16.msra.mxu1 %v163_v9 }
  0x19   :  { %1107 = vmatprep.subr.bf16.mxu1 %v1263_v1 }
  0x1b   :  { %1096 = vmatmul.mubr.msk.bf16.vlgmr.msra.gmra.mrb[4].mxu1 %vm157_vm4, %v1407_v12 }
  0x1c   :  { %1111 = vmatprep.mubr.msk.bf16.mxu1 %vm1264_vm1, %v1263_v1 }
  0x1d   :  { %25 = vsyncpa [#allocation3], 0  ;;  %v1187_v13 = vld [vmem:[%s1606_s7] sm:$0xff]   ;;  %v1188_v14 = vld [vmem:[%s1606_s7 + $0x8] sm:$0xff]   ;;  %s1629_s7 = sld [smem:[#allocation8_spill]]  ;;  %v67_v25 = vlaneseq  ;;  %s1265_s28 = smov 32  }
  0x1e   :  { %1100 = vmatpush3.bf16.msra.mxu0 %v1187_v13  ;;  %v1189_v15 = vld [vmem:[%s1604_s5] sm:$0xff]   ;;  %v1191_v16 = vld [vmem:[%s1604_s5 + $0x8] sm:$0xff]   ;;  %vm239_vm5 = vcmask 261120   ;;  %vm475_vm8 = vcmask 254976   ;;  %s1267_s0 = smov 96   ;;  %vm485_vm9 = vcmask 785920  }
  0x1f   :  { %1101 = vmatprep.subr.bf16.mxu0 %v1263_v1  ;;  %1108 = vmatpush3.bf16.msra.mxu1 %v1189_v15  ;;  %v1190_v27 = vld [vmem:[%s1608_s9] sm:$0xff]   ;;  %v1192_v29 = vld [vmem:[%s1608_s9 + $0x8] sm:$0x7f]   ;;  %v1440_v30 = vand.u32 127, %v67_v25  ;;  %vm738_vm10 = vcmask 523520   ;;  %vm750_vm11 = vcmask 1048320  }
  0x20   :  { %1109 = vmatprep.subr.bf16.mxu1 %v1263_v1  ;;  %v356_v38 = vsel %vm161_vm2, %v1192_v29, 0  ;;  %v1193_v42 = vld [vmem:[%s1607_s8] sm:$0xff]   ;;  %v1194_v44 = vld [vmem:[%s1607_s8 + $0x8] sm:$0xff]   ;;  %vm487_vm12 = vcmask 779776   ;;  %vm740_vm13 = vcmask 517376   ;;  %vm752_vm14 = vcmask 1042176  }
  0x21   :  { %vm212_vm6 = vcmp.lt.s32.totalorder %v1440_v30, 22  ;;  %v1020_v55 = vld [vmem:[%s1610_s11] ss:$0 sm:$0xff]  ;;  %vm489_vm7 = vcmp.lt.s32.totalorder %v1440_v30, 12  ;;  %vm933_vm15 = vcmask 523264  }
  0x22   :  { %1102 = vmatpush3.bf16.msra.mxu0 %v1188_v14  ;;  %v1032_v30 = vld [vmem:[%s1611_s12] ss:$0 sm:$0xff] }
  0x23   :  { %1115 = vmatprep.subr.bf16.mxu0 %v1263_v1  ;;  %1110 = vmatpush3.bf16.msra.mxu1 %v1191_v16  ;;  %v1004_v17 = vld [vmem:[%s1629_s7] ss:$0 sm:$0xff] }
  0x24   :  { %1123 = vmatprep.subr.bf16.mxu1 %v1263_v1 }
  0xe6   :  { %v134_v18 = vpop.f32.mrb[0].mxu1 }
  0xe7   :  { %v135_v19 = vadd.f32 %v1004_v17, %v134_v18  ;;  %v1089_v20 = vpop.f32.mrb[1].mxu1 }
  0xe8   :  { %v137_v21 = vpop.f32.mrb[2].mxu1 }
  0xe9   :  { %v138_v22 = vadd.f32 %v1004_v17, %v137_v21  ;;  %v1090_v23 = vpop.f32.mrb[3].mxu1  ;;  %v210_v24 = vmax.f32 %v135_v19, 0.0 }
  0xeb   :  { %v211_v26 = vmax.f32 %v138_v22, 0.0  ;;  %426 = vrot.lane.b32.xlu1 %v210_v24, %s1265_s28 }
  0xed   :  { %v226_v28 = vpack.c.bf16 %v211_v26, %v210_v24 }
  0xee   :  { %v199_v31 = vpop.f32.mrb[4].mxu1 }
  0xef   :  { %v206_v32 = vadd.f32 %v199_v31, %v135_v19  ;;  %428 = vrot.lane.b32.xlu1 %v211_v26, %s1265_s28  ;;  %v1097_v33 = vpop.f32.mrb[5].mxu1  ;;  %1104 = vmatmul.mubr.msk.bf16.vlgmr.msra.gmra.mrb[0].mxu0 %vm239_vm5, %v226_v28  ;;  %v1196_v31 = vld [vmem:[%s1609_s10] sm:$0xff]  }
  0xf0   :  { %v202_v34 = vpop.f32.mrb[6].mxu1  ;;  %1116 = vmatpush3.bf16.msra.mxu0 %v1190_v27  ;;  %1119 = vmatprep.mubr.msk.bf16.mxu0 %vm1264_vm1, %v1263_v1  ;;  %v1198_v33 = vld [vmem:[%s1609_s10 + $0x8] sm:$0x7f]   ;;  %s1266_s10 = smov 64  }
  0xf1   :  { %v208_v35 = vmax.f32 %v206_v32, 0.0  ;;  %v207_v36 = vadd.f32 %v202_v34, %v138_v22  ;;  %v1098_v37 = vpop.f32.mrb[7].mxu1  ;;  %1117 = vmatprep.subr.bf16.mxu0 %v1263_v1  ;;  %v1195_v32 = vld [vmem:[%s1605_s6] sm:$0xff]   ;;  %v1197_v34 = vld [vmem:[%s1605_s6 + $0x8] sm:$0xff]  }
  0xf3   :  { %v209_v39 = vmax.f32 %v207_v36, 0.0  ;;  %v215_v40 = vsel %vm212_vm6, %v208_v35, 0.0  ;;  %v628_v35 = vsel %vm161_vm2, %v1198_v33, 0 }
  0xf4   :  { %1118 = vmatpush3.bf16.msra.mxu0 %v356_v38 }
  0xf5   :  { %v216_v41 = vsel %vm212_vm6, %v209_v39, 0.0  ;;  %1131 = vmatprep.subr.bf16.mxu0 %v1263_v1 }
  0xf6   :  { %v221_v43 = vpack.c.bf16 %v216_v41, %v215_v40 }
  0xf7   :  { %1120 = vmatmul.mubr.msk.bf16.vlgmr.msra.gmra.mrb[4].mxu0 %vm157_vm4, %v1407_v12 }
  0xf8   :  { %1112 = vmatmul.mubr.msk.bf16.vlgmr.msra.gmra.mrb[8].mxu1 %vm239_vm5, %v221_v43  ;;  %1135 = vmatprep.mubr.msk.bf16.mxu0 %vm1264_vm1, %v1263_v1 }
  0xf9   :  { %1124 = vmatpush3.bf16.msra.mxu1 %v1193_v42  ;;  %1127 = vmatprep.mubr.msk.bf16.mxu1 %vm1264_vm1, %v1263_v1 }
  0xfa   :  { %1125 = vmatprep.subr.bf16.mxu1 %v1263_v1  ;;  %1132 = vmatpush3.bf16.msra.mxu0 %v1195_v32  ;;  %v1203_v32 = vld [vmem:[%s1615_s16] sm:$0xff]  }
  0xfb   :  { %1133 = vmatprep.subr.bf16.mxu0 %v1263_v1 }
  0xfd   :  { %1126 = vmatpush3.bf16.msra.mxu1 %v1194_v44 }
  0xfe   :  { %1139 = vmatprep.subr.bf16.mxu1 %v1263_v1  ;;  %1134 = vmatpush3.bf16.msra.mxu0 %v1197_v34 }
  0xff   :  { %1147 = vmatprep.subr.bf16.mxu0 %v1263_v1 }
 0x100   :  { %1128 = vmatmul.mubr.msk.bf16.vlgmr.msra.gmra.mrb[12].mxu1 %vm239_vm5, %v226_v28 }
 0x101   :  { %1143 = vmatprep.mubr.msk.bf16.mxu1 %vm1264_vm1, %v1263_v1  ;;  %1140 = vmatpush3.bf16.msra.mxu1 %v1196_v31 }
 0x102   :  { %1141 = vmatprep.subr.bf16.mxu1 %v1263_v1 }
 0x105   :  { %1142 = vmatpush3.bf16.msra.mxu1 %v628_v35 }
 0x106   :  { %1155 = vmatprep.subr.bf16.mxu1 %v1263_v1 }
 0x108   :  { %1144 = vmatmul.mubr.msk.bf16.vlgmr.msra.gmra.mrb[16].mxu1 %vm157_vm4, %v1407_v12 }
 0x109   :  { %1159 = vmatprep.mubr.msk.bf16.mxu1 %vm1264_vm1, %v1263_v1 }
 0x15d   :  { %v1479_v20 = vpop.permute.xlu1 %426 }
 0x161   :  { %v1482_v22 = vpop.permute.xlu1 %428 }
 0x1c2   :  { %v277_v45 = vpop.f32.mrb[0].mxu0 }
 0x1c3   :  { %v1105_v46 = vpop.f32.mrb[1].mxu0 }
 0x1c4   :  { %v280_v47 = vpop.f32.mrb[2].mxu0 }
 0x1c5   :  { %v1106_v48 = vpop.f32.mrb[3].mxu0 }
 0x1ca   :  { %v392_v49 = vpop.f32.mrb[4].mxu0 }
 0x1cb   :  { %v333_v50 = vpop.f32.mrb[8].mxu1  ;;  %v1121_v51 = vpop.f32.mrb[5].mxu0 }
 0x1cc   :  { %v334_v52 = vadd.f32 %v333_v50, %v277_v45  ;;  %v1113_v53 = vpop.f32.mrb[9].mxu1  ;;  %v395_v54 = vpop.f32.mrb[6].mxu0 }
 0x1cd   :  { %v336_v56 = vpop.f32.mrb[10].mxu1  ;;  %v1122_v57 = vpop.f32.mrb[7].mxu0 }
 0x1ce   :  { %v399_v58 = vadd.f32 %v392_v49, %v334_v52  ;;  %v337_v59 = vadd.f32 %v336_v56, %v280_v47  ;;  %v1114_v60 = vpop.f32.mrb[11].mxu1 }
 0x1d0   :  { %v408_v61 = vadd.f32 %v1020_v55, %v399_v58  ;;  %v400_v62 = vadd.f32 %v395_v54, %v337_v59 }
 0x1d2   :  { %1207 = vtanh.f32 %v408_v61  ;;  %v409_v63 = vadd.f32 %v1020_v55, %v400_v62  ;;  %v1021_v7 = vmul.f32 -1.442695, %v408_v61 }
 0x1d3   :  { %v1471_v0 = vpop.f32.mrb[12].mxu1 }
 0x1d4   :  { %v1129_v2 = vpop.f32.mrb[13].mxu1  ;;  %1209 = vtanh.f32 %v409_v63  ;;  %v1022_v8 = vmul.f32 -1.442695, %v409_v63 }
 0x1d5   :  { %v1473_v3 = vpop.f32.mrb[14].mxu1  ;;  %1211 = vpow2.f32 %v1021_v7 }
 0x1d6   :  { %v1130_v4 = vpop.f32.mrb[15].mxu1  ;;  %1213 = vpow2.f32 %v1022_v8 }
 0x1db   :  { %v664_v44 = vpop.f32.mrb[16].mxu1 }
 0x1dc   :  { %v1208_v5 = vpop.eup %1207  ;;  %v1145_v45 = vpop.f32.mrb[17].mxu1 }
 0x1dd   :  { %436 = vrot.lane.b32.xlu0 %v1208_v5, %s1265_s28  ;;  %v667_v46 = vpop.f32.mrb[18].mxu1  ;;  %v1041_v45 = vld [vmem:[%s1614_s15] ss:$0 sm:$0xff] }
 0x1de   :  { %v1210_v6 = vpop.eup %1209  ;;  %v1146_v47 = vpop.f32.mrb[19].mxu1 }
 0x1df   :  { %v1212_v9 = vpop.eup %1211 }
 0x1e0   :  { %v416_v10 = vadd.f32 1.0, %v1212_v9  ;;  %v1214_v11 = vpop.eup %1213  ;;  %v1199_v9 = vld [vmem:[%s1613_s14] sm:$0xff]  }
 0x1e1   :  { %438 = vrot.lane.b32.xlu0 %v1210_v6, %s1265_s28  ;;  %v417_v13 = vadd.f32 1.0, %v1214_v11 }
 0x1e2   :  { %1215 = vrcp.f32 %v416_v10 }
 0x1e3   :  { %1217 = vrcp.f32 %v417_v13 }
 0x1ec   :  { %v1216_v14 = vpop.eup %1215 }
 0x1ed   :  { %v1218_v17 = vpop.eup %1217  ;;  %v432_v21 = vmul.f32 %v1216_v14, %v1479_v20 }
 0x1ee   :  { %v433_v25 = vmul.f32 %v1218_v17, %v1482_v22 }
 0x24f   :  { %v437_v15 = vpop.permute.xlu0 %436 }
 0x250   :  { %v442_v16 = vmul.f32 %v1216_v14, %v437_v15 }
 0x252   :  { %446 = vrot.lane.b32.xlu0 %v442_v16, %s1265_s28 }
 0x253   :  { %v439_v18 = vpop.permute.xlu0 %438 }
 0x254   :  { %v443_v19 = vmul.f32 %v1218_v17, %v439_v18 }
 0x256   :  { %448 = vrot.lane.b32.xlu1 %v443_v19, %s1265_s28 }
 0x2c4   :  { %v447_v23 = vpop.permute.xlu0 %446 }
 0x2c5   :  { %v1484_v24 = vadd.f32 %v447_v23, %v432_v21  ;;  %v1201_v21 = vld [vmem:[%s1612_s13] sm:$0xff]  }
 0x2c6   :  { %1156 = vmatpush3.bf16.msra.mxu1 %v1201_v21 }
 0x2c7   :  { %1219 = vtanh.f32 %v1484_v24  ;;  %1157 = vmatprep.subr.bf16.mxu1 %v1263_v1 }
 0x2c8   :  { %v449_v26 = vpop.permute.xlu1 %448 }
 0x2c9   :  { %v1488_v27 = vadd.f32 %v449_v26, %v433_v25 }
 0x2cb   :  { %1221 = vtanh.f32 %v1488_v27 }
 0x2d1   :  { %v1220_v28 = vpop.eup %1219 }
 0x2d2   :  { %458 = vrot.lane.b32.xlu0 %v1220_v28, %s1265_s28 }
 0x2d5   :  { %v1222_v29 = vpop.eup %1221 }
 0x2d6   :  { %460 = vrot.lane.b32.xlu1 %v1222_v29, %s1265_s28 }
 0x344   :  { %v459_v36 = vpop.permute.xlu0 %458 }
 0x345   :  { %v464_v37 = vmul.f32 %v1216_v14, %v459_v36  ;;  %v1200_v14 = vld [vmem:[%s1613_s14 + $0x8] sm:$0xff]  }
 0x347   :  { %468 = vrot.lane.b32.xlu0 %v464_v37, %s1266_s10 }
 0x348   :  { %v461_v38 = vpop.permute.xlu1 %460 }
 0x349   :  { %v465_v39 = vmul.f32 %v1218_v17, %v461_v38  ;;  %v1204_v38 = vld [vmem:[%s1615_s16 + $0x8] sm:$0xff]  }
 0x34b   :  { %470 = vrot.lane.b32.xlu1 %v465_v39, %s1266_s10  ;;  %v1205_v39 = vld [vmem:[%s1615_s16 + $0x10] sm:$0xff]  }
 0x3b9   :  { %v469_v40 = vpop.permute.xlu0 %468 }
 0x3ba   :  { %474 = vst.msk [vmem:[#allocation2] sm:$0xff] %vm239_vm5, %v469_v40  ;;  %v492_v12 = vsel %vm489_vm7, %v469_v40, 0.0  ;;  %v1206_v40 = vld [vmem:[%s1615_s16 + $0x18] sm:$0xff]   ;;  %s1268_s16 = smov [#allocation2]  }
 0x3bb   :  { %s989_s24 = sshll.u32 %s1268_s16, 4  ;;  %s990_s24 = int_to_ptr.vmem [resolvable:$true] %s989_s24 }
 0x3bc   :  { %s1239_s25 = scalar_lea.vmem %s990_s24, 256  ;;  %p1244_p1 = scmp.lt.s32.totalorder %s990_s24, %s990_s24 }
 0x3bd   :  { %v471_v41 = vpop.permute.xlu1 %470  ;;  %p1240_p0 = scmp.ne.s32.totalorder %s990_s24, %s1239_s25  ;;  %p1245_p2 = scmp.lt.s32.totalorder %s1239_s25, %s1239_s25 }
 0x3be   :  { %476 = vst.msk [vmem:[#allocation2 + $0x8] sm:$0x3] %vm475_vm8, %v471_v41  ;;  %v493_v42 = vsel %vm489_vm7, %v471_v41, 0.0 }
 0x3bf   :  { %v498_v43 = vpack.c.bf16 %v493_v42, %v492_v12  ;;  %p1246_p3 = por %p1245_p2, %p1244_p1 }
 0x3c1   :  { %1136 = vmatmul.mubr.msk.bf16.vlgmr.msra.gmra.mrb[8].mxu0 %vm239_vm5, %v498_v43  ;;  %p1247_p4 = pnand %p1246_p3, %p1240_p0 }
 0x3c2   :  { %1151 = vmatprep.mubr.msk.bf16.mxu0 %vm1264_vm1, %v1263_v1  ;;  %1148 = vmatpush3.bf16.msra.mxu0 %v1199_v9 }
 0x3c3   :  { %1149 = vmatprep.subr.bf16.mxu0 %v1263_v1 }
 0x3c6   :  { %1150 = vmatpush3.bf16.msra.mxu0 %v1200_v14 }
 0x3c7   :  { %1163 = vmatprep.subr.bf16.mxu0 %v1263_v1 }
 0x494   :  { %v605_v48 = vpop.f32.mrb[8].mxu0 }
 0x495   :  { %v606_v49 = vadd.f32 %v605_v48, %v1471_v0  ;;  %v1137_v50 = vpop.f32.mrb[9].mxu0 }
 0x496   :  { %v608_v51 = vpop.f32.mrb[10].mxu0 }
 0x497   :  { %v671_v52 = vadd.f32 %v664_v44, %v606_v49  ;;  %v609_v53 = vadd.f32 %v608_v51, %v1473_v3  ;;  %v1138_v54 = vpop.f32.mrb[11].mxu0 }
 0x499   :  { %v680_v55 = vadd.f32 %v1032_v30, %v671_v52  ;;  %v672_v56 = vadd.f32 %v667_v46, %v609_v53 }
 0x49b   :  { %1223 = vtanh.f32 %v680_v55  ;;  %v681_v57 = vadd.f32 %v1032_v30, %v672_v56  ;;  %v1033_v60 = vmul.f32 -1.442695, %v680_v55 }
 0x49d   :  { %1225 = vtanh.f32 %v681_v57  ;;  %v1034_v61 = vmul.f32 -1.442695, %v681_v57 }
 0x49e   :  { %1227 = vpow2.f32 %v1033_v60 }
 0x49f   :  { %1229 = vpow2.f32 %v1034_v61 }
 0x4a5   :  { %v1224_v58 = vpop.eup %1223 }
 0x4a6   :  { %700 = vrot.lane.b32.xlu0 %v1224_v58, %s1265_s28 }
 0x4a7   :  { %v1226_v59 = vpop.eup %1225 }
 0x4a8   :  { %702 = vrot.lane.b32.xlu1 %v1226_v59, %s1265_s28  ;;  %v1228_v62 = vpop.eup %1227 }
 0x4a9   :  { %v1230_v63 = vpop.eup %1229  ;;  %v688_v0 = vadd.f32 1.0, %v1228_v62 }
 0x4aa   :  { %v689_v2 = vadd.f32 1.0, %v1230_v63 }
 0x4ab   :  { %1231 = vrcp.f32 %v688_v0 }
 0x4ac   :  { %1233 = vrcp.f32 %v689_v2 }
 0x4b5   :  { %v1232_v3 = vpop.eup %1231 }
 0x4b6   :  { %v1234_v6 = vpop.eup %1233  ;;  %v696_v10 = vmul.f32 %v1232_v3, %v1479_v20 }
 0x4b7   :  { %v697_v15 = vmul.f32 %v1234_v6, %v1482_v22  ;;  %v1202_v22 = vld [vmem:[%s1612_s13 + $0x8] sm:$0xff]  }
 0x4b8   :  { %1158 = vmatpush3.bf16.msra.mxu1 %v1202_v22 }
 0x518   :  { %v701_v4 = vpop.permute.xlu0 %700 }
 0x519   :  { %v706_v5 = vmul.f32 %v1232_v3, %v701_v4 }
 0x51a   :  { %v703_v7 = vpop.permute.xlu1 %702 }
 0x51b   :  { %710 = vrot.lane.b32.xlu0 %v706_v5, %s1265_s28  ;;  %v707_v8 = vmul.f32 %v1234_v6, %v703_v7 }
 0x51d   :  { %712 = vrot.lane.b32.xlu1 %v707_v8, %s1265_s28 }
 0x58d   :  { %v711_v11 = vpop.permute.xlu0 %710 }
 0x58e   :  { %v716_v13 = vadd.f32 %v711_v11, %v696_v10 }
 0x58f   :  { %v713_v16 = vpop.permute.xlu1 %712 }
 0x590   :  { %1235 = vtanh.f32 %v716_v13  ;;  %v717_v17 = vadd.f32 %v713_v16, %v697_v15 }
 0x592   :  { %1237 = vtanh.f32 %v717_v17  ;;  %v763_v20 = vpack.c.bf16 %v717_v17, %v716_v13 }
 0x59a   :  { %v1236_v18 = vpop.eup %1235 }
 0x59b   :  { %722 = vrot.lane.b32.xlu0 %v1236_v18, %s1265_s28 }
 0x59c   :  { %v1238_v19 = vpop.eup %1237 }
 0x59d   :  { %724 = vrot.lane.b32.xlu1 %v1238_v19, %s1265_s28 }
 0x59f   :  { %765 = vrot.lane.b32.xlu0 %v763_v20, %s1267_s0 }
 0x5a3   :  { %479 = vrot.lane.b32.xlu0 %v1484_v24, %s1265_s28 }
 0x60d   :  { %v723_v23 = vpop.permute.xlu0 %722 }
 0x60e   :  { %v728_v25 = vmul.f32 %v1232_v3, %v723_v23 }
 0x60f   :  { %v725_v26 = vpop.permute.xlu1 %724 }
 0x610   :  { %732 = vrot.lane.b32.xlu0 %v728_v25, %s1267_s0  ;;  %v729_v28 = vmul.f32 %v1234_v6, %v725_v26 }
 0x611   :  { %v766_v29 = vpop.permute.xlu0 %765 }
 0x612   :  { %1152 = vmatmul.mubr.msk.bf16.vlgmr.msra.gmra.mrb[12].mxu0 %vm239_vm5, %v766_v29  ;;  %v758_v31 = vpack.c.bf16 %v729_v28, %v728_v25 }
 0x613   :  { %1171 = vmatprep.mubr.msk.bf16.mxu0 %vm1264_vm1, %v1263_v1  ;;  %1164 = vmatpush3.bf16.msra.mxu0 %v1203_v32 }
 0x614   :  { %744 = vrot.lane.b32.xlu0 %v716_v13, %s1266_s10  ;;  %824 = vrot.lane.b32.xlu1 %v758_v31, %s1266_s10 }
 0x615   :  { %v480_v24 = vpop.permute.xlu0 %479  ;;  %1165 = vmatprep.subr.bf16.mxu0 %v1263_v1 }
 0x616   :  { %486 = vst.msk [vmem:[#allocation2] sm:$0xff] %vm485_vm9, %v480_v24 }
 0x617   :  { %1166 = vmatpush3.bf16.msra.mxu0 %v1204_v38 }
 0x618   :  { %481 = vrot.lane.b32.xlu1 %v1488_v27, %s1265_s28  ;;  %1167 = vmatprep.subr.bf16.mxu0 %v1263_v1 }
 0x61b   :  { %1168 = vmatpush3.bf16.msra.mxu0 %v1205_v39 }
 0x61c   :  { %734 = vrot.lane.b32.xlu1 %v729_v28, %s1267_s0  ;;  %1169 = vmatprep.subr.bf16.mxu0 %v1263_v1 }
 0x61f   :  { %1170 = vmatpush3.bf16.msra.mxu0 %v1206_v40 }
 0x620   :  { %746 = vrot.lane.b32.xlu1 %v717_v17, %s1266_s10 }
 0x682   :  { %v733_v33 = vpop.permute.xlu0 %732 }
 0x683   :  { %739 = vst.msk [vmem:[#allocation2] sm:$0xff] %vm738_vm10, %v733_v33 }
 0x686   :  { %v745_v34 = vpop.permute.xlu0 %744  ;;  %v825_v35 = vpop.permute.xlu1 %824 }
 0x687   :  { %751 = vst.msk [vmem:[#allocation2] sm:$0xff] %vm750_vm11, %v745_v34  ;;  %1160 = vmatmul.mubr.msk.bf16.vlgmr.msra.gmra.mrb[20].mxu1 %vm239_vm5, %v825_v35 }
 0x68a   :  { %v482_v27 = vpop.permute.xlu1 %481 }
 0x68b   :  { %488 = vst.msk [vmem:[#allocation2 + $0x8] sm:$0x3] %vm487_vm12, %v482_v27 }
 0x68e   :  { %v735_v36 = vpop.permute.xlu1 %734 }
 0x68f   :  { %741 = vst.msk [vmem:[#allocation2 + $0x8] sm:$0x3] %vm740_vm13, %v735_v36 }
 0x692   :  { %v747_v37 = vpop.permute.xlu1 %746 }
 0x693   :  { %753 = vst.msk [vmem:[#allocation2 + $0x8] sm:$0x3] %vm752_vm14, %v747_v37 }
 0x6e5   :  { %v816_v41 = vpop.f32.mrb[12].mxu0 }
 0x6e6   :  { %v1153_v12 = vpop.f32.mrb[13].mxu0 }
 0x6e7   :  { %v819_v42 = vpop.f32.mrb[14].mxu0 }
 0x6e8   :  { %v1154_v43 = vpop.f32.mrb[15].mxu0 }
 0x75a   :  { %v875_v44 = vpop.f32.mrb[20].mxu1 }
 0x75b   :  { %v876_v46 = vadd.f32 %v875_v44, %v816_v41  ;;  %v1161_v47 = vpop.f32.mrb[21].mxu1 }
 0x75c   :  { %v878_v48 = vpop.f32.mrb[22].mxu1 }
 0x75d   :  { %v889_v49 = vadd.f32 %v1041_v45, %v876_v46  ;;  %v879_v50 = vadd.f32 %v878_v48, %v819_v42  ;;  %v1162_v1 = vpop.f32.mrb[23].mxu1 }
 0x75f   :  { %v890_v30 = vadd.f32 %v1041_v45, %v879_v50  ;;  %v891_v51 = vmax.f32 %v889_v49, 0.0 }
 0x761   :  { %v892_v52 = vmax.f32 %v890_v30, 0.0 }
 0x763   :  { %v901_v53 = vpack.c.bf16 %v892_v52, %v891_v51 }
 0x765   :  { %1172 = vmatmul.mubr.msk.bf16.vlgmr.msra.gmra.mrb[16].mxu0 %vm933_vm15, %v901_v53 }
 0x766   :  { %1250 = shalt.err (!%p1247_p4)
}
 0x767   :  { %s1251_s26 = scalar_lea.hbm %s1617_s18, 256 }
 0x768   :  { %p1252_p5 = scmp.ne.s32.totalorder %s1617_s18, %s1251_s26  ;;  %p1255_p6 = scmp.lt.u32.totalorder %s1251_s26, %s1617_s18 }
 0x76a   :  { %p1257_p7 = pnand %p1255_p6, %p1252_p5 }
 0x76c   :  { %1260 = shalt.err (!%p1257_p7)
}
 0x76d   :  { %s1269_s7 = smov 128   ;;  %s1270_s5 = smov 8   ;;  %v1042_v54 = vld [vmem:[%s1616_s17] ss:$0 sm:$0xff]  ;;  %vm980_vm0 = vcmask 64512   ;;  %vm982_vm1 = vcmask 58368  }
 0x76e   :  { %995 = dma.vmem_to_hbm [thread:$0]  %s990_s24, 256, %s1617_s18, [#allocation3], %s1269_s7, %s1269_s7, %s1270_s5  }
 0x838   :  { %v971_v55 = vpop.f32.mrb[16].mxu0 }
 0x839   :  { %v972_v56 = vadd.f32 %v1042_v54, %v971_v55  ;;  %v1173_v57 = vpop.f32.mrb[17].mxu0 }
 0x83a   :  { %v974_v58 = vpop.f32.mrb[18].mxu0 }
 0x83b   :  { %v978_v59 = vmax.f32 %v972_v56, 0.0  ;;  %v975_v60 = vadd.f32 %v1042_v54, %v974_v58  ;;  %v1174_v61 = vpop.f32.mrb[19].mxu0 }
 0x83d   :  { %981 = vst.msk [vmem:[%s1618_s19] sm:$0xff] %vm980_vm0, %v978_v59  ;;  %v979_v62 = vmax.f32 %v975_v60, 0.0 }
 0x83f   :  { %983 = vst.msk [vmem:[%s1618_s19 + $0x8] sm:$0x3] %vm982_vm1, %v979_v62 }
 0x840   :  { %1261 = dma.done.wait [#allocation3], 256  }
 0x841   :  { %1262 = vsyncadd [#allocation3], 4294967040 }
 0x842   :  { %1003 = vsyncpa [#allocation3], 1 }

</bundles_post_ra>
